<compile_context>
chip_gen: v6e
topology: v6e:2x2x1
jax: 0.10.0
libtpu: 0.0.40
codegen_flags: <defaults>
</compile_context>

<pallas_src>
import functools

import jax
import jax.numpy as jnp
from jax.experimental import pallas as pl
from jax.experimental.pallas import tpu as pltpu

_NEG_INF = -1.0e9  # padded-action logit bias -> exp() underflows to exactly 0


def _round_up(x, m):
    return (x + m - 1) // m * m


def policy_net_kernel(x_ref, w1_ref, b1_ref, w2_ref, b2_ref, out_ref):
    # fc1 (bf16 inputs, f32 MXU accumulation) + bias + ReLU (kept in f32).
    h = jnp.dot(x_ref[...], w1_ref[...], preferred_element_type=jnp.float32)
    h = jnp.maximum(h + b1_ref[...], 0.0)
    # fc2 (cast activations back to bf16 for the MXU) + bias.
    logits = jnp.dot(h.astype(jnp.bfloat16), w2_ref[...],
                     preferred_element_type=jnp.float32) + b2_ref[...]
    # Numerically-stable softmax over the (padded) action axis. Padded actions
    # carry a -1e9 bias in b2 (applied before the max-subtraction), so their
    # exp() is exactly 0 and they do not perturb the sum.
    m = jnp.max(logits, axis=-1, keepdims=True)
    e = jnp.exp(logits - m)
    denom = jnp.sum(e, axis=-1, keepdims=True)
    # Exact reciprocal: row sums are exactly normalized (REINFORCE-safe).
    out_ref[...] = (e * pl.reciprocal(denom, approx=False)).astype(out_ref.dtype)


def prepare_params(w1, b1, w2, b2):
    """One-time pad + bf16 cast of the policy parameters (hoisted out of the
    per-step forward). w1: (S, H); b1: (1, H) or (H,); w2: (H, A); b2: (1, A) or (A,)."""
    S, H = w1.shape
    A = w2.shape[-1]
    S_pad = _round_up(max(S, 128), 128)
    H_pad = _round_up(max(H, 128), 128)
    A_pad = _round_up(max(A, 128), 128)
    bf16, f32 = jnp.bfloat16, jnp.float32
    w1_p = jnp.zeros((S_pad, H_pad), bf16).at[:S, :H].set(w1.astype(bf16))
    b1_p = jnp.zeros((1, H_pad), f32).at[:, :H].set(jnp.reshape(b1, (1, H)).astype(f32))
    w2_p = jnp.zeros((H_pad, A_pad), bf16).at[:H, :A].set(w2.astype(bf16))
    # Padded action columns get a -1e9 logit bias -> softmax ignores them exactly.
    b2_p = jnp.full((1, A_pad), _NEG_INF, f32).at[:, :A].set(jnp.reshape(b2, (1, A)).astype(f32))
    return {"w1": w1_p, "b1": b1_p, "w2": w2_p, "b2": b2_p}


@functools.partial(jax.jit, static_argnames=("action_space", "batch_tile", "out_dtype"))
def policy_network_forward(x, params, *, action_space, batch_tile=None,
                           out_dtype=jnp.float32):
    """x: (B, state_space) f32 -> (B, action_space) softmax probabilities."""
    B, S = x.shape
    w1_p, b1_p, w2_p, b2_p = params["w1"], params["b1"], params["w2"], params["b2"]
    S_pad, H_pad = w1_p.shape
    A_pad = w2_p.shape[1]
    A = action_space

    # Batch tile: multiple of 16 (bf16 sublane packing); 128 fills the v5e MXU
    # and gives >=2 parallel grid steps (both v7x TCs) once B > 128; 256 fills
    # the 256-wide v6e/v7x MXU for large batches.
    if batch_tile is None:
        batch_tile = 256 if B >= 512 else min(128, _round_up(B, 16))
    B_pad = _round_up(B, batch_tile)

    # Only per-call prep: pad/cast x (fused into this jit; zero padding is inert).
    x_p = jnp.zeros((B_pad, S_pad), jnp.bfloat16).at[:B, :S].set(x.astype(jnp.bfloat16))

    grid = (B_pad // batch_tile,)
    out_bytes = jnp.dtype(out_dtype).itemsize

    cost = pl.CostEstimate(
        flops=2 * B_pad * (S_pad * H_pad + H_pad * A_pad),
        transcendentals=B_pad * A_pad + B_pad,  # exp + reciprocal
        bytes_accessed=(x_p.size * 2 + w1_p.size * 2 + w2_p.size * 2
                        + b1_p.size * 4 + b2_p.size * 4
                        + B_pad * A_pad * out_bytes),
    )

    # Explicit VMEM budget (guard for v7x's 64 MiB physical VMEM if the hidden
    # layer is ever scaled up).
    # TODO(synk): single-buffer the invariant weight operands
    # (pipeline_mode=pl.Buffered(1)) once S/H grow into the thousands.
    weight_bytes = w1_p.size * 2 + w2_p.size * 2 + b1_p.size * 4 + b2_p.size * 4
    io_bytes = batch_tile * (S_pad * 2 + A_pad * out_bytes)
    vmem_limit = int(min(64 * 2**20,
                         max(32 * 2**20, 2 * (weight_bytes + io_bytes) + 4 * 2**20)))

    out = pl.pallas_call(
        policy_net_kernel,
        out_shape=jax.ShapeDtypeStruct((B_pad, A_pad), out_dtype),
        grid_spec=pltpu.PrefetchScalarGridSpec(
            num_scalar_prefetch=0,
            grid=grid,
            in_specs=[
                pl.BlockSpec((batch_tile, S_pad), lambda i: (i, 0)),  # x tile
                pl.BlockSpec((S_pad, H_pad), lambda i: (0, 0)),       # w1 resident
                pl.BlockSpec((1, H_pad), lambda i: (0, 0)),           # b1 resident
                pl.BlockSpec((H_pad, A_pad), lambda i: (0, 0)),       # w2 resident
                pl.BlockSpec((1, A_pad), lambda i: (0, 0)),           # b2 resident
            ],
            out_specs=pl.BlockSpec((batch_tile, A_pad), lambda i: (i, 0)),
        ),
        compiler_params=pltpu.CompilerParams(
            dimension_semantics=("parallel",),
            vmem_limit_bytes=vmem_limit,
        ),
        cost_estimate=cost,
    )(x_p, w1_p, b1_p, w2_p, b2_p)

    # Slice away batch/action padding (fused into the jit, no extra dispatch).
    return out[:B, :A]


def init_params(key, state_space, action_space, hidden_size=128):
    """Deterministic uniform init mirroring nn.Linear's default fan-in scaling."""
    k1, k2, k3, k4 = jax.random.split(key, 4)
    lim1 = 1.0 / jnp.sqrt(state_space)
    lim2 = 1.0 / jnp.sqrt(hidden_size)
    # Stored as (in, out) = PyTorch weight.T so the kernel does x @ w directly.
    w1 = jax.random.uniform(k1, (state_space, hidden_size), jnp.float32, -lim1, lim1)
    b1 = jax.random.uniform(k2, (1, hidden_size), jnp.float32, -lim1, lim1)
    w2 = jax.random.uniform(k3, (hidden_size, action_space), jnp.float32, -lim2, lim2)
    b2 = jax.random.uniform(k4, (1, action_space), jnp.float32, -lim2, lim2)
    return w1, b1, w2, b2


if __name__ == "__main__":
    # Shapes consistent with a REINFORCE policy: batch=8 states of dim 16,
    # hidden=128 (module default), 4 discrete actions.
    batch, state_space, hidden_size, action_space = 8, 16, 128, 4

    key = jax.random.PRNGKey(0)
    kx, kp = jax.random.split(key)
    x = jax.random.normal(kx, (batch, state_space), dtype=jnp.float32)
    w1, b1, w2, b2 = init_params(kp, state_space, action_space, hidden_size)

    # One-time parameter prep (padding + bf16 cast hoisted out of the RL step).
    params = prepare_params(w1, b1, w2, b2)

    probs = policy_network_forward(x, params, action_space=action_space)
    probs = jax.block_until_ready(probs)

    # Sanity check against a pure-JAX f32 reference (loose tolerance: bf16
    # matmul inputs with f32 accumulation).
    ref = jax.nn.softmax(jnp.maximum(x @ w1 + b1, 0.0) @ w2 + b2, axis=1)
    assert probs.shape == (batch, action_space)
    assert jnp.allclose(probs, ref, atol=1e-2, rtol=1e-2)
    assert jnp.allclose(jnp.sum(probs, axis=1), 1.0, atol=1e-3)

    print("KERNEL_OK")
</pallas_src>

<mosaic_0001>
module attributes {stable_mosaic.version = 11 : i64} {
  func.func @policy_net_kernel(%arg0: i32, %arg1: memref<16x128xbf16, #tpu.memory_space<vmem>>, %arg2: memref<128x128xbf16, #tpu.memory_space<vmem>>, %arg3: memref<1x128xf32, #tpu.memory_space<vmem>>, %arg4: memref<128x128xbf16, #tpu.memory_space<vmem>>, %arg5: memref<1x128xf32, #tpu.memory_space<vmem>>, %arg6: memref<16x128xf32, #tpu.memory_space<vmem>>) attributes {dimension_semantics = [#tpu.dimension_semantics<parallel>], iteration_bounds = array<i64: 1>, scalar_prefetch = 0 : i64, scratch_operands = 0 : i64, tpu.core_type = #tpu.core_type<tc>, window_params = [{transform_indices = @transform_0, window_bounds = array<i64: 16, 128>}, {pipeline_mode = #tpu.pipeline_mode<synchronous>, transform_indices = @transform_1, window_bounds = array<i64: 128, 128>}, {pipeline_mode = #tpu.pipeline_mode<synchronous>, transform_indices = @transform_2, window_bounds = array<i64: 1, 128>}, {pipeline_mode = #tpu.pipeline_mode<synchronous>, transform_indices = @transform_3, window_bounds = array<i64: 128, 128>}, {pipeline_mode = #tpu.pipeline_mode<synchronous>, transform_indices = @transform_4, window_bounds = array<i64: 1, 128>}, {transform_indices = @transform_5, window_bounds = array<i64: 16, 128>}]} {
    %c0 = arith.constant 0 : index
    %c0_0 = arith.constant 0 : index
    %0 = vector.load %arg1[%c0, %c0_0] : memref<16x128xbf16, #tpu.memory_space<vmem>>, vector<16x128xbf16>
    %c0_1 = arith.constant 0 : index
    %c0_2 = arith.constant 0 : index
    %1 = vector.load %arg2[%c0_1, %c0_2] : memref<128x128xbf16, #tpu.memory_space<vmem>>, vector<128x128xbf16>
    %cst = arith.constant dense<0.000000e+00> : vector<16x128xf32>
    %2 = tpu.matmul %0, %1, %cst {dimension_numbers = #tpu.dot_dimension_numbers<[1], [0], [0], [1], [0, 0, 1, 1], [], []>} : vector<16x128xbf16>, vector<128x128xbf16>, vector<16x128xf32> -> vector<16x128xf32>
    %c0_3 = arith.constant 0 : index
    %c0_4 = arith.constant 0 : index
    %3 = vector.load %arg3[%c0_3, %c0_4] : memref<1x128xf32, #tpu.memory_space<vmem>>, vector<1x128xf32>
    %4 = vector.broadcast %3 : vector<1x128xf32> to vector<16x128xf32>
    %5 = arith.addf %2, %4 : vector<16x128xf32>
    %cst_5 = arith.constant 0.000000e+00 : f32
    %6 = vector.broadcast %cst_5 : f32 to vector<16x128xf32>
    %7 = arith.maximumf %5, %6 : vector<16x128xf32>
    %8 = arith.truncf %7 : vector<16x128xf32> to vector<16x128xbf16>
    %c0_6 = arith.constant 0 : index
    %c0_7 = arith.constant 0 : index
    %9 = vector.load %arg4[%c0_6, %c0_7] : memref<128x128xbf16, #tpu.memory_space<vmem>>, vector<128x128xbf16>
    %cst_8 = arith.constant dense<0.000000e+00> : vector<16x128xf32>
    %10 = tpu.matmul %8, %9, %cst_8 {dimension_numbers = #tpu.dot_dimension_numbers<[1], [0], [0], [1], [0, 0, 1, 1], [], []>} : vector<16x128xbf16>, vector<128x128xbf16>, vector<16x128xf32> -> vector<16x128xf32>
    %c0_9 = arith.constant 0 : index
    %c0_10 = arith.constant 0 : index
    %11 = vector.load %arg5[%c0_9, %c0_10] : memref<1x128xf32, #tpu.memory_space<vmem>>, vector<1x128xf32>
    %12 = vector.broadcast %11 : vector<1x128xf32> to vector<16x128xf32>
    %13 = arith.addf %10, %12 : vector<16x128xf32>
    %cst_11 = arith.constant dense<0xFF800000> : vector<16xf32>
    %14 = vector.multi_reduction <maximumf>, %13, %cst_11 [1] : vector<16x128xf32> to vector<16xf32>
    %15 = vector.shape_cast %14 : vector<16xf32> to vector<16x1xf32>
    %16 = vector.broadcast %15 : vector<16x1xf32> to vector<16x128xf32>
    %17 = arith.subf %13, %16 : vector<16x128xf32>
    %18 = math.exp %17 : vector<16x128xf32>
    %cst_12 = arith.constant dense<0.000000e+00> : vector<16xf32>
    %19 = vector.multi_reduction <add>, %18, %cst_12 [1] : vector<16x128xf32> to vector<16xf32>
    %20 = vector.shape_cast %19 : vector<16xf32> to vector<16x1xf32>
    %21 = tpu.reciprocal %20 : vector<16x1xf32> -> vector<16x1xf32>
    %22 = vector.broadcast %21 : vector<16x1xf32> to vector<16x128xf32>
    %23 = arith.mulf %18, %22 : vector<16x128xf32>
    %c0_13 = arith.constant 0 : index
    %c0_14 = arith.constant 0 : index
    %24 = vector.load %arg6[%c0_13, %c0_14] : memref<16x128xf32, #tpu.memory_space<vmem>>, vector<16x128xf32>
    tpu.vector_store %arg6[%c0_13, %c0_14], %23 {strides = array<i32>} : memref<16x128xf32, #tpu.memory_space<vmem>>, vector<16x128xf32>,
    return
  }
  func.func @transform_0(%arg0: i32) -> (i32, i32) {
    %c0_i32 = arith.constant 0 : i32
    %c0_i32_0 = arith.constant 0 : i32
    return %arg0, %c0_i32 : i32, i32
  }
  func.func @transform_1(%arg0: i32) -> (i32, i32) {
    %c0_i32 = arith.constant 0 : i32
    %c0_i32_0 = arith.constant 0 : i32
    %c0_i32_1 = arith.constant 0 : i32
    return %c0_i32, %c0_i32_0 : i32, i32
  }
  func.func @transform_2(%arg0: i32) -> (i32, i32) {
    %c0_i32 = arith.constant 0 : i32
    %c0_i32_0 = arith.constant 0 : i32
    %c0_i32_1 = arith.constant 0 : i32
    return %c0_i32, %c0_i32_0 : i32, i32
  }
  func.func @transform_3(%arg0: i32) -> (i32, i32) {
    %c0_i32 = arith.constant 0 : i32
    %c0_i32_0 = arith.constant 0 : i32
    %c0_i32_1 = arith.constant 0 : i32
    return %c0_i32, %c0_i32_0 : i32, i32
  }
  func.func @transform_4(%arg0: i32) -> (i32, i32) {
    %c0_i32 = arith.constant 0 : i32
    %c0_i32_0 = arith.constant 0 : i32
    %c0_i32_1 = arith.constant 0 : i32
    return %c0_i32, %c0_i32_0 : i32, i32
  }
  func.func @transform_5(%arg0: i32) -> (i32, i32) {
    %c0_i32 = arith.constant 0 : i32
    %c0_i32_0 = arith.constant 0 : i32
    return %arg0, %c0_i32 : i32, i32
  }
}

</mosaic_0001>

<bundles_post_ra>
// kernel: policy_network_forward.1
= control target key start
LH: loop header
LB: loop body
LE: loop exit
PB: predicated region body
PF: predicated region fallthrough
CT: control target
= control target key end

     0   :  { %10 = vsyncpa [#allocation3], 0  ;;  %s519_s0 = inlined_call_operand.vmem [shape: bf16[16,128], index: 0, kind: input, shape index: {}]   ;;  %s520_s1 = inlined_call_operand.hbm [shape: bf16[128,128], index: 1, kind: input, shape index: {}]   ;;  %s521_s2 = inlined_call_operand.vmem [shape: f32[1,128], index: 2, kind: input, shape index: {}]   ;;  %s522_s3 = inlined_call_operand.hbm [shape: bf16[128,128], index: 3, kind: input, shape index: {}]   ;;  %s523_s4 = inlined_call_operand.vmem [shape: f32[1,128], index: 4, kind: input, shape index: {}]   ;;  %s524_s5 = inlined_call_operand.vmem [shape: f32[16,128], index: 5, kind: output, shape index: {}]  }
   0x1   :  { %11 = vsyncpa [#allocation5], 0  ;;  %s462_s18 = smov [#allocation2]  }
   0x2   :  { %s19_s19 = sshll.u32 %s462_s18, 4  ;;  %s20_s19 = int_to_ptr.vmem [resolvable:$true] %s19_s19 }
   0x3   :  { %s426_s20 = scalar_lea.vmem %s20_s19, 1024  ;;  %p431_p1 = scmp.lt.s32.totalorder %s20_s19, %s20_s19 }
   0x4   :  { %p427_p0 = scmp.ne.s32.totalorder %s20_s19, %s426_s20  ;;  %p432_p2 = scmp.lt.s32.totalorder %s426_s20, %s426_s20 }
   0x6   :  { %p433_p3 = por %p432_p2, %p431_p1 }
   0x8   :  { %p434_p4 = pnand %p433_p3, %p427_p0 }
   0xa   :  { %437 = shalt.err (!%p434_p4)
}
   0xb   :  { %s463_s21 = smov 64   ;;  %s464_s22 = smov 4  }
   0xc   :  { %25 = dma.hbm_to_vmem [thread:$0]  %s520_s1, 1024, %s20_s19, [#allocation3], %s463_s21, %s463_s21, %s464_s22  }
   0xd   :  { %s465_s25 = smov [#allocation4]  }
   0xe   :  { %s33_s26 = sshll.u32 %s465_s25, 4  ;;  %s34_s26 = int_to_ptr.vmem [resolvable:$true] %s33_s26 }
   0xf   :  { %s446_s27 = scalar_lea.vmem %s34_s26, 1024  ;;  %p451_p6 = scmp.lt.s32.totalorder %s34_s26, %s34_s26 }
  0x10   :  { %p447_p5 = scmp.ne.s32.totalorder %s34_s26, %s446_s27  ;;  %p452_p7 = scmp.lt.s32.totalorder %s446_s27, %s446_s27 }
  0x12   :  { %p453_p8 = por %p452_p7, %p451_p6 }
  0x14   :  { %p454_p9 = pnand %p453_p8, %p447_p5 }
  0x16   :  { %457 = shalt.err (!%p454_p9)
}
  0x17   :  { %39 = dma.hbm_to_vmem [thread:$0]  %s522_s3, 1024, %s34_s26, [#allocation5], %s463_s21, %s463_s21, %s464_s22  }
  0x18   :  { %458 = dma.done.wait [#allocation3], 1024  }
  0x19   :  { %459 = vsyncadd [#allocation3], 4294966272 }
  0x1a   :  { %460 = dma.done.wait [#allocation5], 1024  }
  0x1b   :  { %461 = vsyncadd [#allocation5], 4294966272  ;;  %v466_v0 = vmov 0.0   ;;  %vm467_vm0 = vmmov 0   ;;  %v393_v1 = vld [vmem:[#allocation2 + $0x38] sm:$0xff]   ;;  %v394_v2 = vld [vmem:[#allocation2 + $0x30] sm:$0xff]  }
  0x1c   :  { %347 = vmatprep.subr.bf16.mxu0 %v466_v0  ;;  %363 = vmatprep.mubr.msk.bf16.mxu0 %vm467_vm0, %v466_v0  ;;  %v395_v3 = vld [vmem:[#allocation2 + $0x28] sm:$0xff]   ;;  %v402_v4 = vld [vmem:[#allocation4 + $0x38] sm:$0xff]   ;;  %v396_v5 = vld [vmem:[#allocation2 + $0x20] sm:$0xff]  }
  0x1d   :  { %367 = vmatprep.subr.bf16.mxu1 %v466_v0  ;;  %383 = vmatprep.mubr.msk.bf16.mxu1 %vm467_vm0, %v466_v0  ;;  %v403_v6 = vld [vmem:[#allocation4 + $0x30] sm:$0xff]   ;;  %v397_v7 = vld [vmem:[#allocation2 + $0x18] sm:$0xff]   ;;  %v404_v8 = vld [vmem:[#allocation4 + $0x28] sm:$0xff]  }
  0x1e   :  { %348 = vmatpush3.bf16.msra.mxu0 %v393_v1  ;;  %368 = vmatpush3.bf16.msra.mxu1 %v402_v4  ;;  %v398_v9 = vld [vmem:[#allocation2 + $0x10] sm:$0xff]   ;;  %v405_v10 = vld [vmem:[#allocation4 + $0x20] sm:$0xff]   ;;  %v399_v11 = vld [vmem:[#allocation2 + $0x8] sm:$0xff]  }
  0x1f   :  { %349 = vmatprep.subr.bf16.mxu0 %v466_v0  ;;  %369 = vmatprep.subr.bf16.mxu1 %v466_v0  ;;  %v406_v12 = vld [vmem:[#allocation4 + $0x18] sm:$0xff]   ;;  %v400_v13 = vld [vmem:[#allocation2] sm:$0xff]   ;;  %v407_v15 = vld [vmem:[#allocation4 + $0x10] sm:$0xff]  }
  0x20   :  { %v401_v14 = vld [vmem:[%s519_s0] sm:$0xff]   ;;  %v408_v16 = vld [vmem:[#allocation4 + $0x8] sm:$0xff]  }
  0x21   :  { %v409_v17 = vld [vmem:[#allocation4] sm:$0xff]  }
  0x22   :  { %350 = vmatpush3.bf16.msra.mxu0 %v394_v2  ;;  %370 = vmatpush3.bf16.msra.mxu1 %v403_v6  ;;  %v310_v18 = vld [vmem:[%s521_s2] ss:$0 sm:$0xff] }
  0x23   :  { %351 = vmatprep.subr.bf16.mxu0 %v466_v0  ;;  %371 = vmatprep.subr.bf16.mxu1 %v466_v0  ;;  %v320_v28 = vld [vmem:[%s523_s4] ss:$0 sm:$0xff] }
  0x26   :  { %352 = vmatpush3.bf16.msra.mxu0 %v395_v3  ;;  %372 = vmatpush3.bf16.msra.mxu1 %v404_v8 }
  0x27   :  { %353 = vmatprep.subr.bf16.mxu0 %v466_v0  ;;  %373 = vmatprep.subr.bf16.mxu1 %v466_v0 }
  0x2a   :  { %354 = vmatpush3.bf16.msra.mxu0 %v396_v5  ;;  %374 = vmatpush3.bf16.msra.mxu1 %v405_v10 }
  0x2b   :  { %355 = vmatprep.subr.bf16.mxu0 %v466_v0  ;;  %375 = vmatprep.subr.bf16.mxu1 %v466_v0 }
  0x2e   :  { %356 = vmatpush3.bf16.msra.mxu0 %v397_v7  ;;  %376 = vmatpush3.bf16.msra.mxu1 %v406_v12 }
  0x2f   :  { %357 = vmatprep.subr.bf16.mxu0 %v466_v0  ;;  %377 = vmatprep.subr.bf16.mxu1 %v466_v0 }
  0x32   :  { %358 = vmatpush3.bf16.msra.mxu0 %v398_v9  ;;  %378 = vmatpush3.bf16.msra.mxu1 %v407_v15 }
  0x33   :  { %359 = vmatprep.subr.bf16.mxu0 %v466_v0  ;;  %379 = vmatprep.subr.bf16.mxu1 %v466_v0 }
  0x36   :  { %360 = vmatpush3.bf16.msra.mxu0 %v399_v11  ;;  %380 = vmatpush3.bf16.msra.mxu1 %v408_v16 }
  0x37   :  { %361 = vmatprep.subr.bf16.mxu0 %v466_v0  ;;  %381 = vmatprep.subr.bf16.mxu1 %v466_v0 }
  0x3a   :  { %362 = vmatpush3.bf16.msra.mxu0 %v400_v13  ;;  %382 = vmatpush3.bf16.msra.mxu1 %v409_v17 }
  0x3d   :  { %364 = vmatmul.mubr.bf16.vlgmr.msra.gmra.mxu0 %v401_v14 }
  0xfd   :  { %v162_v19 = vpop.f32.mrf.mxu0 }
  0xfe   :  { %v163_v21 = vadd.f32 %v310_v18, %v162_v19 }
  0xff   :  { %v365_v20 = vpop.f32.mrf.mxu0 }
 0x100   :  { %v169_v25 = vmax.f32 %v163_v21, 0.0 }
 0x101   :  { %v165_v22 = vpop.f32.mrf.mxu0 }
 0x102   :  { %v166_v23 = vadd.f32 %v310_v18, %v165_v22 }
 0x103   :  { %v366_v24 = vpop.f32.mrf.mxu0 }
 0x104   :  { %v170_v26 = vmax.f32 %v166_v23, 0.0 }
 0x106   :  { %v171_v27 = vpack.c.bf16 %v170_v26, %v169_v25 }
 0x108   :  { %384 = vmatmul.mubr.bf16.vlgmr.msra.gmra.mxu1 %v171_v27 }
 0x1c8   :  { %v277_v29 = vpop.f32.mrf.mxu1 }
 0x1c9   :  { %v278_v30 = vadd.f32 %v320_v28, %v277_v29 }
 0x1ca   :  { %v385_v31 = vpop.f32.mrf.mxu1 }
 0x1cb   :  { %284 = vmax.xlane.f32.xlu0 %v278_v30 }
 0x1cc   :  { %v280_v32 = vpop.f32.mrf.mxu1 }
 0x1cd   :  { %v281_v33 = vadd.f32 %v320_v28, %v280_v32 }
 0x1ce   :  { %v386_v34 = vpop.f32.mrf.mxu1 }
 0x1cf   :  { %286 = vmax.xlane.f32.xlu0 %v281_v33 }
 0x254   :  { %v285_v35 = vpop.xlane.xlu0 %284 }
 0x255   :  { %v288_v36 = vsub.f32 %v278_v30, %v285_v35 }
 0x257   :  { %v290_v37 = vmul.f32 1.442695, %v288_v36 }
 0x258   :  { %v287_v38 = vpop.xlane.xlu0 %286 }
 0x259   :  { %410 = vpow2.f32 %v290_v37  ;;  %v289_v39 = vsub.f32 %v281_v33, %v287_v38 }
 0x25b   :  { %v292_v40 = vmul.f32 1.442695, %v289_v39 }
 0x25d   :  { %412 = vpow2.f32 %v292_v40 }
 0x266   :  { %v411_v41 = vpop.eup %410 }
 0x267   :  { %294 = vadd.xlane.f32.xlu1 %v411_v41 }
 0x26a   :  { %v413_v42 = vpop.eup %412 }
 0x26b   :  { %296 = vadd.xlane.f32.xlu1 %v413_v42 }
 0x2f0   :  { %v295_v43 = vpop.xlane.xlu1 %294 }
 0x2f1   :  { %414 = vrcp.f32 %v295_v43 }
 0x2f4   :  { %v297_v44 = vpop.xlane.xlu1 %296 }
 0x2f5   :  { %416 = vrcp.f32 %v297_v44 }
 0x2fe   :  { %v415_v45 = vpop.eup %414 }
 0x2ff   :  { %v300_v46 = vmul.f32 %v415_v45, %v411_v41 }
 0x301   :  { %302 = vst [vmem:[%s524_s5] sm:$0xff] %v300_v46 }
 0x302   :  { %v417_v47 = vpop.eup %416 }
 0x303   :  { %v301_v48 = vmul.f32 %v417_v47, %v413_v42 }
 0x305   :  { %303 = vst [vmem:[%s524_s5 + $0x8] sm:$0xff] %v301_v48 }
 0x306   :  { %308 = vsyncpa [#allocation3], 1 }
 0x307   :  { %309 = vsyncpa [#allocation5], 1 }

</bundles_post_ra>
